<compile_context>
chip_gen: v6e
topology: v6e:2x2x1
jax: 0.10.0
libtpu: 0.0.40
codegen_flags: <defaults>
</compile_context>

<pallas_src>
import functools

import jax
import jax.numpy as jnp
import numpy as np
from jax.experimental import pallas as pl
from jax.experimental.pallas import tpu as pltpu


def _mha_kernel(q_ref, k_ref, v_ref, gamma_ref, beta_ref, wt_ref, bout_ref,
                o_ref, *, heads, scale, eps):
    B, N, D = q_ref.shape
    d_head = D // heads

    # Hoist gamma/beta once (JAX does not CSE broadcast_in_dim).
    gamma = gamma_ref[...].astype(jnp.float32)       # (1, D)
    beta = beta_ref[...].astype(jnp.float32)         # (1, D)

    def layer_norm(x):                               # x: (B*N, D)
        x = x.astype(jnp.float32)
        mu = jnp.mean(x, axis=-1, keepdims=True)
        var = jnp.mean((x - mu) ** 2, axis=-1, keepdims=True)
        return (x - mu) * jax.lax.rsqrt(var + eps) * gamma + beta

    # (B, N, D) -> (B*N, D) merges only major dims at a multiple of the sublane
    # tile: layout-free.  LayerNorm runs once per input on the full slab.
    qn = layer_norm(q_ref[...].reshape(B * N, D)) * scale   # fold softmax scale once
    kn = layer_norm(k_ref[...].reshape(B * N, D))
    vn = layer_norm(v_ref[...].reshape(B * N, D))

    # head_mask[h, j] = 1 iff feature column j belongs to head h.
    # Built with compares only (no integer division).
    col = jax.lax.broadcasted_iota(jnp.int32, (heads, D), 1)
    row = jax.lax.broadcasted_iota(jnp.int32, (heads, D), 0)
    lo = row * d_head
    head_mask = ((col >= lo) & (col < lo + d_head)).astype(jnp.float32)  # (H, D)

    contract_last = (((1,), (1,)), ((), ()))         # contract last dim of both

    outs = []
    for b in range(B):                               # static, small, unrolled
        # Sublane-aligned (multiple-of-8) slices: no lane slicing.
        qb = qn[b * N:(b + 1) * N, :]                # (N, D)
        kb = kn[b * N:(b + 1) * N, :]
        vb = vn[b * N:(b + 1) * N, :]

        # Per-head queries with other heads' features zeroed, stacked on the
        # sublane axis: (H, N, D) -> (H*N, D).
        qm = (head_mask[:, None, :] * qb[None, :, :]).reshape(heads * N, D)

        # scores[h*N + n, m] = scale * <q_h[n], k_h[m]>  (no explicit k.T).
        s = jax.lax.dot_general(qm, kb, contract_last,
                                preferred_element_type=jnp.float32)  # (H*N, N)

        # Numerically stable softmax over keys (last axis).
        m = jnp.max(s, axis=-1, keepdims=True)
        e = jnp.exp(s - m)
        denom = jnp.sum(e, axis=-1, keepdims=True)
        attn = e * pl.reciprocal(denom, approx=True)  # EUP slot, not VPU divide
        # dropout(p=0) in eval mode -> identity

        # (H*N, N) @ (N, D) -> (H*N, D); keep head h's own feature columns for
        # row block h and sum over heads -> 'b h n d -> b n (h d)'.
        o = jnp.dot(attn, vb, preferred_element_type=jnp.float32)
        merged = (o.reshape(heads, N, D) * head_mask[:, None, :]).sum(axis=0)
        outs.append(merged)                          # (N, D)

    out_all = jnp.concatenate(outs, axis=0)          # (B*N, D), sublane concat

    # to_out: Linear(inner_dim, dim) with bias.  Weight pre-transposed in the
    # wrapper -> single (B*N, D) @ (D, D) MXU call, no in-kernel transpose.
    wt = wt_ref[...].astype(jnp.float32)             # (D, D) == torch W.T
    bias = bout_ref[...].astype(jnp.float32)         # (1, D)
    proj = jnp.dot(out_all, wt, preferred_element_type=jnp.float32) + bias

    o_ref[...] = proj.reshape(B, N, D).astype(o_ref.dtype)


def multi_head_attention(q, k, v, gamma, beta, w_out, b_out, *, heads):
    B, N, D = q.shape
    assert D % heads == 0, "dim must be divisible by heads"
    d_head = D // heads
    scale = float(d_head) ** -0.5

    w_out_t = w_out.T                                # one-time host/XLA transpose

    kernel = functools.partial(_mha_kernel, heads=heads, scale=scale, eps=1e-5)

    full3 = pl.BlockSpec((B, N, D), lambda i: (0, 0, 0))
    vec = pl.BlockSpec((1, D), lambda i: (0, 0))
    mat = pl.BlockSpec((D, D), lambda i: (0, 0))

    return pl.pallas_call(
        kernel,
        out_shape=jax.ShapeDtypeStruct((B, N, D), q.dtype),
        grid=(1,),                                   # single step: no per-step overhead
        in_specs=[full3, full3, full3, vec, vec, mat, vec],
        out_specs=full3,
        compiler_params=pltpu.CompilerParams(
            dimension_semantics=("arbitrary",)),
    )(q, k, v, gamma, beta, w_out_t, b_out)


def _reference(q, k, v, gamma, beta, w_out, b_out, *, heads):
    """Pure-JAX reference mirroring the PyTorch forward (mask=None, eval)."""
    eps = 1e-5

    def ln(x):
        mu = jnp.mean(x, axis=-1, keepdims=True)
        var = jnp.mean((x - mu) ** 2, axis=-1, keepdims=True)
        return (x - mu) / jnp.sqrt(var + eps) * gamma[0] + beta[0]

    qn, kn, vn = ln(q), ln(k), ln(v)
    B, N, D = q.shape
    d = D // heads
    scale = float(d) ** -0.5

    def split(x):  # b n (h d) -> b h n d
        return jnp.transpose(x.reshape(B, N, heads, d), (0, 2, 1, 3))

    qh, kh, vh = split(qn), split(kn), split(vn)
    dots = jnp.einsum("bhnd,bhmd->bhnm", qh, kh) * scale
    attn = jax.nn.softmax(dots, axis=-1)
    out = jnp.einsum("bhnm,bhmd->bhnd", attn, vh)
    out = jnp.transpose(out, (0, 2, 1, 3)).reshape(B, N, D)
    return out @ w_out.T + b_out[0]


if __name__ == "__main__":
    B, N, DIM, HEADS = 2, 8, 32, 8

    key = jax.random.PRNGKey(0)
    kq, kk, kv, kw, kb = jax.random.split(key, 5)

    q = jax.random.normal(kq, (B, N, DIM), dtype=jnp.float32)
    k = jax.random.normal(kk, (B, N, DIM), dtype=jnp.float32)
    v = jax.random.normal(kv, (B, N, DIM), dtype=jnp.float32)

    # Deterministic parameters:
    #   nn.LayerNorm(dim): weight=ones, bias=zeros
    #   to_out Linear(inner_dim, dim): weight (dim, dim) torch (out,in) layout, bias (dim,)
    gamma = jnp.ones((1, DIM), dtype=jnp.float32)
    beta = jnp.zeros((1, DIM), dtype=jnp.float32)
    w_out = 0.05 * jax.random.normal(kw, (DIM, DIM), dtype=jnp.float32)
    b_out = 0.05 * jax.random.normal(kb, (1, DIM), dtype=jnp.float32)

    out = multi_head_attention(q, k, v, gamma, beta, w_out, b_out, heads=HEADS)
    out = jax.block_until_ready(out)

    ref = _reference(q, k, v, gamma, beta, w_out, b_out, heads=HEADS)
    # Tolerance covers the EUP approximate reciprocal used for the softmax
    # denominator (pl.reciprocal(approx=True), ~1e-4 relative).
    np.testing.assert_allclose(np.asarray(out), np.asarray(ref),
                               rtol=2e-3, atol=2e-3)

    print("KERNEL_OK")
</pallas_src>

<mosaic_0001>
module attributes {stable_mosaic.version = 11 : i64} {
  func.func @_mha_kernel(%arg0: i32, %arg1: memref<2x8x32xf32, #tpu.memory_space<vmem>>, %arg2: memref<2x8x32xf32, #tpu.memory_space<vmem>>, %arg3: memref<2x8x32xf32, #tpu.memory_space<vmem>>, %arg4: memref<1x32xf32, #tpu.memory_space<vmem>>, %arg5: memref<1x32xf32, #tpu.memory_space<vmem>>, %arg6: memref<32x32xf32, #tpu.memory_space<vmem>>, %arg7: memref<1x32xf32, #tpu.memory_space<vmem>>, %arg8: memref<2x8x32xf32, #tpu.memory_space<vmem>>) attributes {dimension_semantics = [#tpu.dimension_semantics<arbitrary>], iteration_bounds = array<i64: 1>, scalar_prefetch = 0 : i64, scratch_operands = 0 : i64, tpu.core_type = #tpu.core_type<tc>, window_params = [{pipeline_mode = #tpu.pipeline_mode<synchronous>, transform_indices = @transform_0, window_bounds = array<i64: 2, 8, 32>}, {pipeline_mode = #tpu.pipeline_mode<synchronous>, transform_indices = @transform_1, window_bounds = array<i64: 2, 8, 32>}, {pipeline_mode = #tpu.pipeline_mode<synchronous>, transform_indices = @transform_2, window_bounds = array<i64: 2, 8, 32>}, {pipeline_mode = #tpu.pipeline_mode<synchronous>, transform_indices = @transform_3, window_bounds = array<i64: 1, 32>}, {pipeline_mode = #tpu.pipeline_mode<synchronous>, transform_indices = @transform_4, window_bounds = array<i64: 1, 32>}, {pipeline_mode = #tpu.pipeline_mode<synchronous>, transform_indices = @transform_5, window_bounds = array<i64: 32, 32>}, {pipeline_mode = #tpu.pipeline_mode<synchronous>, transform_indices = @transform_6, window_bounds = array<i64: 1, 32>}, {pipeline_mode = #tpu.pipeline_mode<synchronous>, transform_indices = @transform_7, window_bounds = array<i64: 2, 8, 32>}]} {
    %c0 = arith.constant 0 : index
    %c0_0 = arith.constant 0 : index
    %0 = vector.load %arg4[%c0, %c0_0] : memref<1x32xf32, #tpu.memory_space<vmem>>, vector<1x32xf32>
    %c0_1 = arith.constant 0 : index
    %c0_2 = arith.constant 0 : index
    %1 = vector.load %arg5[%c0_1, %c0_2] : memref<1x32xf32, #tpu.memory_space<vmem>>, vector<1x32xf32>
    %c0_3 = arith.constant 0 : index
    %c0_4 = arith.constant 0 : index
    %c0_5 = arith.constant 0 : index
    %2 = vector.load %arg1[%c0_3, %c0_4, %c0_5] : memref<2x8x32xf32, #tpu.memory_space<vmem>>, vector<2x8x32xf32>
    %3 = vector.shape_cast %2 : vector<2x8x32xf32> to vector<16x32xf32>
    %cst = arith.constant dense<0.000000e+00> : vector<16xf32>
    %4 = vector.multi_reduction <add>, %3, %cst [1] : vector<16x32xf32> to vector<16xf32>
    %5 = vector.shape_cast %4 : vector<16xf32> to vector<16x1xf32>
    %cst_6 = arith.constant 3.200000e+01 : f32
    %6 = vector.broadcast %cst_6 : f32 to vector<16x1xf32>
    %7 = arith.divf %5, %6 : vector<16x1xf32>
    %8 = vector.broadcast %7 : vector<16x1xf32> to vector<16x32xf32>
    %9 = arith.subf %3, %8 : vector<16x32xf32>
    %10 = arith.mulf %9, %9 : vector<16x32xf32>
    %cst_7 = arith.constant dense<0.000000e+00> : vector<16xf32>
    %11 = vector.multi_reduction <add>, %10, %cst_7 [1] : vector<16x32xf32> to vector<16xf32>
    %12 = vector.shape_cast %11 : vector<16xf32> to vector<16x1xf32>
    %cst_8 = arith.constant 3.200000e+01 : f32
    %13 = vector.broadcast %cst_8 : f32 to vector<16x1xf32>
    %14 = arith.divf %12, %13 : vector<16x1xf32>
    %15 = vector.broadcast %7 : vector<16x1xf32> to vector<16x32xf32>
    %16 = arith.subf %3, %15 : vector<16x32xf32>
    %cst_9 = arith.constant 9.99999974E-6 : f32
    %17 = vector.broadcast %cst_9 : f32 to vector<16x1xf32>
    %18 = arith.addf %14, %17 : vector<16x1xf32>
    %19 = math.rsqrt %18 : vector<16x1xf32>
    %20 = vector.broadcast %19 : vector<16x1xf32> to vector<16x32xf32>
    %21 = arith.mulf %16, %20 : vector<16x32xf32>
    %22 = vector.broadcast %0 : vector<1x32xf32> to vector<16x32xf32>
    %23 = arith.mulf %21, %22 : vector<16x32xf32>
    %24 = vector.broadcast %1 : vector<1x32xf32> to vector<16x32xf32>
    %25 = arith.addf %23, %24 : vector<16x32xf32>
    %cst_10 = arith.constant 5.000000e-01 : f32
    %26 = vector.broadcast %cst_10 : f32 to vector<16x32xf32>
    %27 = arith.mulf %25, %26 : vector<16x32xf32>
    %c0_11 = arith.constant 0 : index
    %c0_12 = arith.constant 0 : index
    %c0_13 = arith.constant 0 : index
    %28 = vector.load %arg2[%c0_11, %c0_12, %c0_13] : memref<2x8x32xf32, #tpu.memory_space<vmem>>, vector<2x8x32xf32>
    %29 = vector.shape_cast %28 : vector<2x8x32xf32> to vector<16x32xf32>
    %cst_14 = arith.constant dense<0.000000e+00> : vector<16xf32>
    %30 = vector.multi_reduction <add>, %29, %cst_14 [1] : vector<16x32xf32> to vector<16xf32>
    %31 = vector.shape_cast %30 : vector<16xf32> to vector<16x1xf32>
    %cst_15 = arith.constant 3.200000e+01 : f32
    %32 = vector.broadcast %cst_15 : f32 to vector<16x1xf32>
    %33 = arith.divf %31, %32 : vector<16x1xf32>
    %34 = vector.broadcast %33 : vector<16x1xf32> to vector<16x32xf32>
    %35 = arith.subf %29, %34 : vector<16x32xf32>
    %36 = arith.mulf %35, %35 : vector<16x32xf32>
    %cst_16 = arith.constant dense<0.000000e+00> : vector<16xf32>
    %37 = vector.multi_reduction <add>, %36, %cst_16 [1] : vector<16x32xf32> to vector<16xf32>
    %38 = vector.shape_cast %37 : vector<16xf32> to vector<16x1xf32>
    %cst_17 = arith.constant 3.200000e+01 : f32
    %39 = vector.broadcast %cst_17 : f32 to vector<16x1xf32>
    %40 = arith.divf %38, %39 : vector<16x1xf32>
    %41 = vector.broadcast %33 : vector<16x1xf32> to vector<16x32xf32>
    %42 = arith.subf %29, %41 : vector<16x32xf32>
    %cst_18 = arith.constant 9.99999974E-6 : f32
    %43 = vector.broadcast %cst_18 : f32 to vector<16x1xf32>
    %44 = arith.addf %40, %43 : vector<16x1xf32>
    %45 = math.rsqrt %44 : vector<16x1xf32>
    %46 = vector.broadcast %45 : vector<16x1xf32> to vector<16x32xf32>
    %47 = arith.mulf %42, %46 : vector<16x32xf32>
    %48 = vector.broadcast %0 : vector<1x32xf32> to vector<16x32xf32>
    %49 = arith.mulf %47, %48 : vector<16x32xf32>
    %50 = vector.broadcast %1 : vector<1x32xf32> to vector<16x32xf32>
    %51 = arith.addf %49, %50 : vector<16x32xf32>
    %c0_19 = arith.constant 0 : index
    %c0_20 = arith.constant 0 : index
    %c0_21 = arith.constant 0 : index
    %52 = vector.load %arg3[%c0_19, %c0_20, %c0_21] : memref<2x8x32xf32, #tpu.memory_space<vmem>>, vector<2x8x32xf32>
    %53 = vector.shape_cast %52 : vector<2x8x32xf32> to vector<16x32xf32>
    %cst_22 = arith.constant dense<0.000000e+00> : vector<16xf32>
    %54 = vector.multi_reduction <add>, %53, %cst_22 [1] : vector<16x32xf32> to vector<16xf32>
    %55 = vector.shape_cast %54 : vector<16xf32> to vector<16x1xf32>
    %cst_23 = arith.constant 3.200000e+01 : f32
    %56 = vector.broadcast %cst_23 : f32 to vector<16x1xf32>
    %57 = arith.divf %55, %56 : vector<16x1xf32>
    %58 = vector.broadcast %57 : vector<16x1xf32> to vector<16x32xf32>
    %59 = arith.subf %53, %58 : vector<16x32xf32>
    %60 = arith.mulf %59, %59 : vector<16x32xf32>
    %cst_24 = arith.constant dense<0.000000e+00> : vector<16xf32>
    %61 = vector.multi_reduction <add>, %60, %cst_24 [1] : vector<16x32xf32> to vector<16xf32>
    %62 = vector.shape_cast %61 : vector<16xf32> to vector<16x1xf32>
    %cst_25 = arith.constant 3.200000e+01 : f32
    %63 = vector.broadcast %cst_25 : f32 to vector<16x1xf32>
    %64 = arith.divf %62, %63 : vector<16x1xf32>
    %65 = vector.broadcast %57 : vector<16x1xf32> to vector<16x32xf32>
    %66 = arith.subf %53, %65 : vector<16x32xf32>
    %cst_26 = arith.constant 9.99999974E-6 : f32
    %67 = vector.broadcast %cst_26 : f32 to vector<16x1xf32>
    %68 = arith.addf %64, %67 : vector<16x1xf32>
    %69 = math.rsqrt %68 : vector<16x1xf32>
    %70 = vector.broadcast %69 : vector<16x1xf32> to vector<16x32xf32>
    %71 = arith.mulf %66, %70 : vector<16x32xf32>
    %72 = vector.broadcast %0 : vector<1x32xf32> to vector<16x32xf32>
    %73 = arith.mulf %71, %72 : vector<16x32xf32>
    %74 = vector.broadcast %1 : vector<1x32xf32> to vector<16x32xf32>
    %75 = arith.addf %73, %74 : vector<16x32xf32>
    %76 = tpu.iota {dimensions = array<i32: 1>} : vector<8x32xi32>
    %77 = tpu.iota {dimensions = array<i32: 0>} : vector<8x32xi32>
    %c4_i32 = arith.constant 4 : i32
    %78 = vector.broadcast %c4_i32 : i32 to vector<8x32xi32>
    %79 = arith.muli %77, %78 : vector<8x32xi32>
    %80 = arith.cmpi sge, %76, %79 : vector<8x32xi32>
    %c4_i32_27 = arith.constant 4 : i32
    %81 = vector.broadcast %c4_i32_27 : i32 to vector<8x32xi32>
    %82 = arith.addi %79, %81 : vector<8x32xi32>
    %83 = arith.cmpi slt, %76, %82 : vector<8x32xi32>
    %84 = arith.andi %80, %83 : vector<8x32xi1>
    %85 = arith.extui %84 : vector<8x32xi1> to vector<8x32xi32>
    %86 = arith.sitofp %85 : vector<8x32xi32> to vector<8x32xf32>
    %87 = vector.extract_strided_slice %27 {offsets = [0, 0], sizes = [8, 32], strides = [1, 1]} : vector<16x32xf32> to vector<8x32xf32>
    %88 = vector.extract_strided_slice %51 {offsets = [0, 0], sizes = [8, 32], strides = [1, 1]} : vector<16x32xf32> to vector<8x32xf32>
    %89 = vector.extract_strided_slice %75 {offsets = [0, 0], sizes = [8, 32], strides = [1, 1]} : vector<16x32xf32> to vector<8x32xf32>
    %90 = vector.shape_cast %86 : vector<8x32xf32> to vector<8x1x32xf32>
    %91 = vector.shape_cast %87 : vector<8x32xf32> to vector<1x8x32xf32>
    %92 = vector.broadcast %90 : vector<8x1x32xf32> to vector<8x8x32xf32>
    %93 = vector.broadcast %91 : vector<1x8x32xf32> to vector<8x8x32xf32>
    %94 = arith.mulf %92, %93 : vector<8x8x32xf32>
    %95 = vector.shape_cast %94 : vector<8x8x32xf32> to vector<64x32xf32>
    %cst_28 = arith.constant dense<0.000000e+00> : vector<64x8xf32>
    %96 = tpu.matmul %95, %88, %cst_28 {dimension_numbers = #tpu.dot_dimension_numbers<[1], [1], [0], [0], [0, 0, 1, 0], [], []>} : vector<64x32xf32>, vector<8x32xf32>, vector<64x8xf32> -> vector<64x8xf32>
    %cst_29 = arith.constant dense<0xFF800000> : vector<64xf32>
    %97 = vector.multi_reduction <maximumf>, %96, %cst_29 [1] : vector<64x8xf32> to vector<64xf32>
    %98 = vector.shape_cast %97 : vector<64xf32> to vector<64x1xf32>
    %99 = vector.broadcast %98 : vector<64x1xf32> to vector<64x8xf32>
    %100 = arith.subf %96, %99 : vector<64x8xf32>
    %101 = math.exp %100 : vector<64x8xf32>
    %cst_30 = arith.constant dense<0.000000e+00> : vector<64xf32>
    %102 = vector.multi_reduction <add>, %101, %cst_30 [1] : vector<64x8xf32> to vector<64xf32>
    %103 = vector.shape_cast %102 : vector<64xf32> to vector<64x1xf32>
    %104 = tpu.reciprocal %103 {approx = true} : vector<64x1xf32> -> vector<64x1xf32>
    %105 = vector.broadcast %104 : vector<64x1xf32> to vector<64x8xf32>
    %106 = arith.mulf %101, %105 : vector<64x8xf32>
    %cst_31 = arith.constant dense<0.000000e+00> : vector<64x32xf32>
    %107 = tpu.matmul %106, %89, %cst_31 {dimension_numbers = #tpu.dot_dimension_numbers<[1], [0], [0], [1], [0, 0, 1, 1], [], []>} : vector<64x8xf32>, vector<8x32xf32>, vector<64x32xf32> -> vector<64x32xf32>
    %108 = vector.shape_cast %107 : vector<64x32xf32> to vector<8x8x32xf32>
    %109 = vector.shape_cast %86 : vector<8x32xf32> to vector<8x1x32xf32>
    %110 = vector.broadcast %109 : vector<8x1x32xf32> to vector<8x8x32xf32>
    %111 = arith.mulf %108, %110 : vector<8x8x32xf32>
    %cst_32 = arith.constant dense<0.000000e+00> : vector<8x32xf32>
    %112 = vector.multi_reduction <add>, %111, %cst_32 [0] : vector<8x8x32xf32> to vector<8x32xf32>
    %113 = vector.extract_strided_slice %27 {offsets = [8, 0], sizes = [8, 32], strides = [1, 1]} : vector<16x32xf32> to vector<8x32xf32>
    %114 = vector.extract_strided_slice %51 {offsets = [8, 0], sizes = [8, 32], strides = [1, 1]} : vector<16x32xf32> to vector<8x32xf32>
    %115 = vector.extract_strided_slice %75 {offsets = [8, 0], sizes = [8, 32], strides = [1, 1]} : vector<16x32xf32> to vector<8x32xf32>
    %116 = vector.shape_cast %86 : vector<8x32xf32> to vector<8x1x32xf32>
    %117 = vector.shape_cast %113 : vector<8x32xf32> to vector<1x8x32xf32>
    %118 = vector.broadcast %116 : vector<8x1x32xf32> to vector<8x8x32xf32>
    %119 = vector.broadcast %117 : vector<1x8x32xf32> to vector<8x8x32xf32>
    %120 = arith.mulf %118, %119 : vector<8x8x32xf32>
    %121 = vector.shape_cast %120 : vector<8x8x32xf32> to vector<64x32xf32>
    %cst_33 = arith.constant dense<0.000000e+00> : vector<64x8xf32>
    %122 = tpu.matmul %121, %114, %cst_33 {dimension_numbers = #tpu.dot_dimension_numbers<[1], [1], [0], [0], [0, 0, 1, 0], [], []>} : vector<64x32xf32>, vector<8x32xf32>, vector<64x8xf32> -> vector<64x8xf32>
    %cst_34 = arith.constant dense<0xFF800000> : vector<64xf32>
    %123 = vector.multi_reduction <maximumf>, %122, %cst_34 [1] : vector<64x8xf32> to vector<64xf32>
    %124 = vector.shape_cast %123 : vector<64xf32> to vector<64x1xf32>
    %125 = vector.broadcast %124 : vector<64x1xf32> to vector<64x8xf32>
    %126 = arith.subf %122, %125 : vector<64x8xf32>
    %127 = math.exp %126 : vector<64x8xf32>
    %cst_35 = arith.constant dense<0.000000e+00> : vector<64xf32>
    %128 = vector.multi_reduction <add>, %127, %cst_35 [1] : vector<64x8xf32> to vector<64xf32>
    %129 = vector.shape_cast %128 : vector<64xf32> to vector<64x1xf32>
    %130 = tpu.reciprocal %129 {approx = true} : vector<64x1xf32> -> vector<64x1xf32>
    %131 = vector.broadcast %130 : vector<64x1xf32> to vector<64x8xf32>
    %132 = arith.mulf %127, %131 : vector<64x8xf32>
    %cst_36 = arith.constant dense<0.000000e+00> : vector<64x32xf32>
    %133 = tpu.matmul %132, %115, %cst_36 {dimension_numbers = #tpu.dot_dimension_numbers<[1], [0], [0], [1], [0, 0, 1, 1], [], []>} : vector<64x8xf32>, vector<8x32xf32>, vector<64x32xf32> -> vector<64x32xf32>
    %134 = vector.shape_cast %133 : vector<64x32xf32> to vector<8x8x32xf32>
    %135 = vector.shape_cast %86 : vector<8x32xf32> to vector<8x1x32xf32>
    %136 = vector.broadcast %135 : vector<8x1x32xf32> to vector<8x8x32xf32>
    %137 = arith.mulf %134, %136 : vector<8x8x32xf32>
    %cst_37 = arith.constant dense<0.000000e+00> : vector<8x32xf32>
    %138 = vector.multi_reduction <add>, %137, %cst_37 [0] : vector<8x8x32xf32> to vector<8x32xf32>
    %139 = tpu.concatenate %112, %138 in 0 : vector<8x32xf32>, vector<8x32xf32> -> vector<16x32xf32>
    %c0_38 = arith.constant 0 : index
    %c0_39 = arith.constant 0 : index
    %140 = vector.load %arg6[%c0_38, %c0_39] : memref<32x32xf32, #tpu.memory_space<vmem>>, vector<32x32xf32>
    %c0_40 = arith.constant 0 : index
    %c0_41 = arith.constant 0 : index
    %141 = vector.load %arg7[%c0_40, %c0_41] : memref<1x32xf32, #tpu.memory_space<vmem>>, vector<1x32xf32>
    %cst_42 = arith.constant dense<0.000000e+00> : vector<16x32xf32>
    %142 = tpu.matmul %139, %140, %cst_42 {dimension_numbers = #tpu.dot_dimension_numbers<[1], [0], [0], [1], [0, 0, 1, 1], [], []>} : vector<16x32xf32>, vector<32x32xf32>, vector<16x32xf32> -> vector<16x32xf32>
    %143 = vector.broadcast %141 : vector<1x32xf32> to vector<16x32xf32>
    %144 = arith.addf %142, %143 : vector<16x32xf32>
    %145 = vector.shape_cast %144 : vector<16x32xf32> to vector<2x8x32xf32>
    %c0_43 = arith.constant 0 : index
    %c0_44 = arith.constant 0 : index
    %c0_45 = arith.constant 0 : index
    %146 = vector.load %arg8[%c0_43, %c0_44, %c0_45] : memref<2x8x32xf32, #tpu.memory_space<vmem>>, vector<2x8x32xf32>
    tpu.vector_store %arg8[%c0_43, %c0_44, %c0_45], %145 {strides = array<i32>} : memref<2x8x32xf32, #tpu.memory_space<vmem>>, vector<2x8x32xf32>,
    return
  }
  func.func @transform_0(%arg0: i32) -> (i32, i32, i32) {
    %c0_i32 = arith.constant 0 : i32
    %c0_i32_0 = arith.constant 0 : i32
    %c0_i32_1 = arith.constant 0 : i32
    %c0_i32_2 = arith.constant 0 : i32
    return %c0_i32, %c0_i32_0, %c0_i32_1 : i32, i32, i32
  }
  func.func @transform_1(%arg0: i32) -> (i32, i32, i32) {
    %c0_i32 = arith.constant 0 : i32
    %c0_i32_0 = arith.constant 0 : i32
    %c0_i32_1 = arith.constant 0 : i32
    %c0_i32_2 = arith.constant 0 : i32
    return %c0_i32, %c0_i32_0, %c0_i32_1 : i32, i32, i32
  }
  func.func @transform_2(%arg0: i32) -> (i32, i32, i32) {
    %c0_i32 = arith.constant 0 : i32
    %c0_i32_0 = arith.constant 0 : i32
    %c0_i32_1 = arith.constant 0 : i32
    %c0_i32_2 = arith.constant 0 : i32
    return %c0_i32, %c0_i32_0, %c0_i32_1 : i32, i32, i32
  }
  func.func @transform_3(%arg0: i32) -> (i32, i32) {
    %c0_i32 = arith.constant 0 : i32
    %c0_i32_0 = arith.constant 0 : i32
    %c0_i32_1 = arith.constant 0 : i32
    return %c0_i32, %c0_i32_0 : i32, i32
  }
  func.func @transform_4(%arg0: i32) -> (i32, i32) {
    %c0_i32 = arith.constant 0 : i32
    %c0_i32_0 = arith.constant 0 : i32
    %c0_i32_1 = arith.constant 0 : i32
    return %c0_i32, %c0_i32_0 : i32, i32
  }
  func.func @transform_5(%arg0: i32) -> (i32, i32) {
    %c0_i32 = arith.constant 0 : i32
    %c0_i32_0 = arith.constant 0 : i32
    %c0_i32_1 = arith.constant 0 : i32
    return %c0_i32, %c0_i32_0 : i32, i32
  }
  func.func @transform_6(%arg0: i32) -> (i32, i32) {
    %c0_i32 = arith.constant 0 : i32
    %c0_i32_0 = arith.constant 0 : i32
    %c0_i32_1 = arith.constant 0 : i32
    return %c0_i32, %c0_i32_0 : i32, i32
  }
  func.func @transform_7(%arg0: i32) -> (i32, i32, i32) {
    %c0_i32 = arith.constant 0 : i32
    %c0_i32_0 = arith.constant 0 : i32
    %c0_i32_1 = arith.constant 0 : i32
    %c0_i32_2 = arith.constant 0 : i32
    return %c0_i32, %c0_i32_0, %c0_i32_1 : i32, i32, i32
  }
}

</mosaic_0001>

<bundles_post_ra>
// kernel: tpu_custom_call.1
= control target key start
LH: loop header
LB: loop body
LE: loop exit
PB: predicated region body
PF: predicated region fallthrough
CT: control target
= control target key end

     0   :  { %12 = vsyncpa [#allocation3], 0  ;;  %s1813_s0 = inlined_call_operand.hbm [shape: f32[2,8,32], index: 0, kind: input, shape index: {}]   ;;  %s1814_s1 = inlined_call_operand.hbm [shape: f32[2,8,32], index: 1, kind: input, shape index: {}]   ;;  %s1815_s2 = inlined_call_operand.hbm [shape: f32[2,8,32], index: 2, kind: input, shape index: {}]   ;;  %s1816_s3 = inlined_call_operand.vmem [shape: f32[1,32], index: 3, kind: input, shape index: {}]   ;;  %s1817_s4 = inlined_call_operand.vmem [shape: f32[1,32], index: 4, kind: input, shape index: {}]   ;;  %s1818_s5 = inlined_call_operand.hbm [shape: f32[32,32], index: 5, kind: input, shape index: {}]   ;;  %s1819_s6 = inlined_call_operand.vmem [shape: f32[1,32], index: 6, kind: input, shape index: {}]   ;;  %s1820_s7 = inlined_call_operand.hbm [shape: f32[2,8,32], index: 7, kind: output, shape index: {}]  }
   0x1   :  { %13 = vsyncpa [#allocation6], 0 }
   0x2   :  { %14 = vsyncpa [#allocation9], 0 }
   0x3   :  { %15 = vsyncpa [#allocation4], 0  ;;  %s1513_s24 = smov [#allocation5]   ;;  %s1514_s26 = smov [#allocation2]  }
   0x4   :  { %s33_s25 = sshll.u32 %s1513_s24, 4  ;;  %s21_s27 = sshll.u32 %s1514_s26, 4  ;;  %s34_s25 = int_to_ptr.vmem [resolvable:$true] %s33_s25  ;;  %s22_s27 = int_to_ptr.vmem [resolvable:$true] %s21_s27 }
   0x5   :  { %s1413_s28 = scalar_lea.vmem %s34_s25, 256  ;;  %p1418_p1 = scmp.lt.s32.totalorder %s34_s25, %s34_s25 }
   0x6   :  { %p1414_p0 = scmp.ne.s32.totalorder %s34_s25, %s1413_s28  ;;  %p1419_p2 = scmp.lt.s32.totalorder %s1413_s28, %s1413_s28 }
   0x8   :  { %p1420_p3 = por %p1419_p2, %p1418_p1 }
   0xa   :  { %p1421_p4 = pnand %p1420_p3, %p1414_p0 }
   0xc   :  { %1424 = shalt.err (!%p1421_p4)
}
   0xd   :  { %s1515_s29 = smov 128   ;;  %s1516_s30 = smov 8  }
   0xe   :  { %39 = dma.hbm_to_vmem [thread:$0]  %s1814_s1, 256, %s34_s25, [#allocation6], %s1515_s29, %s1515_s29, %s1516_s30  }
   0xf   :  { %s1433_s10 = scalar_lea.vmem %s22_s27, 256  ;;  %p1438_p6 = scmp.lt.s32.totalorder %s22_s27, %s22_s27 }
  0x10   :  { %p1434_p5 = scmp.ne.s32.totalorder %s22_s27, %s1433_s10  ;;  %p1439_p7 = scmp.lt.s32.totalorder %s1433_s10, %s1433_s10 }
  0x12   :  { %p1440_p8 = por %p1439_p7, %p1438_p6 }
  0x14   :  { %p1441_p9 = pnand %p1440_p8, %p1434_p5 }
  0x16   :  { %1444 = shalt.err (!%p1441_p9)
}
  0x17   :  { %27 = dma.hbm_to_vmem [thread:$0]  %s1813_s0, 256, %s22_s27, [#allocation3], %s1515_s29, %s1515_s29, %s1516_s30  }
  0x18   :  { %s1517_s13 = smov [#allocation7]   ;;  %s1518_s15 = smov [#allocation8]  }
  0x19   :  { %s45_s14 = sshll.u32 %s1517_s13, 4  ;;  %s61_s16 = sshll.u32 %s1518_s15, 4  ;;  %s46_s14 = int_to_ptr.vmem [resolvable:$true] %s45_s14  ;;  %s62_s16 = int_to_ptr.vmem [resolvable:$true] %s61_s16 }
  0x1a   :  { %s1453_s1 = scalar_lea.vmem %s46_s14, 256  ;;  %p1458_p11 = scmp.lt.s32.totalorder %s46_s14, %s46_s14 }
  0x1b   :  { %p1454_p10 = scmp.ne.s32.totalorder %s46_s14, %s1453_s1  ;;  %p1459_p12 = scmp.lt.s32.totalorder %s1453_s1, %s1453_s1 }
  0x1d   :  { %p1460_p13 = por %p1459_p12, %p1458_p11 }
  0x1f   :  { %p1461_p0 = pnand %p1460_p13, %p1454_p10 }
  0x21   :  { %1464 = shalt.err (!%p1461_p0)
}
  0x22   :  { %51 = dma.hbm_to_vmem [thread:$0]  %s1815_s2, 256, %s46_s14, [#allocation6], %s1515_s29, %s1515_s29, %s1516_s30  }
  0x23   :  { %s1473_s0 = scalar_lea.vmem %s62_s16, 512  ;;  %p1478_p2 = scmp.lt.s32.totalorder %s62_s16, %s62_s16 }
  0x24   :  { %p1474_p1 = scmp.ne.s32.totalorder %s62_s16, %s1473_s0  ;;  %p1479_p3 = scmp.lt.s32.totalorder %s1473_s0, %s1473_s0 }
  0x26   :  { %p1480_p4 = por %p1479_p3, %p1478_p2 }
  0x28   :  { %p1481_p5 = pnand %p1480_p4, %p1474_p1 }
  0x2a   :  { %1484 = shalt.err (!%p1481_p5)
}
  0x2b   :  { %67 = dma.hbm_to_vmem [thread:$0]  %s1818_s5, 512, %s62_s16, [#allocation9], %s1515_s29, %s1515_s29, %s1516_s30  }
  0x2c   :  { %1505 = dma.done.wait [#allocation3], 256  }
  0x2d   :  { %1506 = vsyncadd [#allocation3], 4294967040 }
  0x2e   :  { %1507 = dma.done.wait [#allocation6], 512  }
  0x2f   :  { %1508 = vsyncadd [#allocation6], 4294966784 }
  0x30   :  { %1509 = dma.done.wait [#allocation9], 512  }
  0x31   :  { %1510 = vsyncadd [#allocation9], 4294966784  ;;  %vm86_vm0 = vcmask 261120   ;;  %v84_v0 = vld [vmem:[#allocation2] sm:$0xff]  ;;  %v132_v1 = vld [vmem:[#allocation5] sm:$0xff]  ;;  %v196_v14 = vlaneseq  ;;  %v1520_v29 = vmov 0.0  }
  0x32   :  { %v87_v2 = vsel %vm86_vm0, %v84_v0, 0.0  ;;  %v134_v3 = vsel %vm86_vm0, %v132_v1, 0.0  ;;  %v1519_v20 = vmov 1966171168   ;;  %v1593_v33 = vld [vmem:[%s1816_s3] ss:$0 sm:$0xff] }
  0x33   :  { %88 = vadd.xlane.f32.xlu0 %v87_v2  ;;  %v199_v15 = vshrl.u32 %v196_v14, 7  ;;  %v210_v21 = vunpack.c.l.s4 %v1519_v20  ;;  %v197_v23 = vand.u32 127, %v196_v14  ;;  %v1598_v38 = vld [vmem:[%s1817_s4] ss:$0 sm:$0xff]  ;;  %vm437_vm4 = vcmask 64512   ;;  %s1521_s23 = smov [#allocation10]  }
  0x34   :  { %s1157_s24 = sshll.u32 %s1521_s23, 4  ;;  %s1158_s24 = int_to_ptr.vmem [resolvable:$true] %s1157_s24 }
  0x35   :  { %v200_v17 = vmul.u32 4, %v199_v15  ;;  %v211_v27 = vunpack.c.0.s8 %v210_v21  ;;  %v259_v37 = vsub.s32 0, %v199_v15  ;;  %s1485_s25 = scalar_lea.vmem %s1158_s24, 256  ;;  %p1490_p7 = scmp.lt.s32.totalorder %s1158_s24, %s1158_s24 }
  0x36   :  { %p1486_p6 = scmp.ne.s32.totalorder %s1158_s24, %s1485_s25  ;;  %p1491_p8 = scmp.lt.s32.totalorder %s1485_s25, %s1485_s25 }
  0x37   :  { %135 = vadd.xlane.f32.xlu0 %v134_v3  ;;  %v202_v24 = vadd.s32 4, %v200_v17  ;;  %vm201_vm1 = vcmp.ge.s32.totalorder %v197_v23, %v200_v17  ;;  %v214_v28 = vsub.s32 %v211_v27, %v199_v15  ;;  %v133_v27 = vld [vmem:[#allocation5 + $0x8] sm:$0xff] }
  0x38   :  { %p1492_p9 = por %p1491_p8, %p1490_p7 }
  0x39   :  { %vm203_vm2 = vcmp.lt.s32.totalorder %v197_v23, %v202_v24  ;;  %v85_v23 = vld [vmem:[#allocation2 + $0x8] sm:$0xff] }
  0x3a   :  { %vm204_vm3 = vmand %vm201_vm1, %vm203_vm2  ;;  %p1493_p10 = pnand %p1492_p9, %p1486_p6 }
  0x3b   :  { %v1173_v30 = vsel %vm204_vm3, 1.0, %v1520_v29  ;;  %v137_v29 = vsel %vm86_vm0, %v133_v27, 0.0 }
  0x3c   :  { %v215_v31 = vrot.slane %v1173_v30, %v214_v28  ;;  %v208_v34 = vcombine.high %v1173_v30, %v1173_v30 }
  0x3e   :  { %v223_v36 = vcombine.high %v215_v31, %v215_v31  ;;  %v231_v39 = vrot.slane %v215_v31, %v214_v28  ;;  %v222_v42 = vrot.slane %v208_v34, %v214_v28 }
  0x40   :  { %v1602_v45 = vrot.slane %v231_v39, %v259_v37  ;;  %v245_v46 = vrot.slane %v223_v36, %v214_v28  ;;  %v253_v47 = vcombine.high %v231_v39, %v231_v39  ;;  %v224_v50 = vcombine.high %v222_v42, %v222_v42 }
  0x41   :  { %v238_v56 = vrot.slane %v222_v42, %v214_v28 }
  0x42   :  { %v1607_v53 = vrot.slane %v245_v46, %v259_v37  ;;  %v255_v54 = vcombine.high %v245_v46, %v245_v46  ;;  %v1609_v55 = vrot.slane %v253_v47, %v259_v37  ;;  %v252_v59 = vrot.slane %v224_v50, %v214_v28 }
  0x43   :  { %v1618_v61 = vrot.slane %v238_v56, %v259_v37  ;;  %v254_v62 = vcombine.high %v238_v56, %v238_v56 }
  0x44   :  { %v1615_v58 = vrot.slane %v255_v54, %v259_v37 }
  0x45   :  { %v1626_v3 = vrot.slane %v254_v62, %v259_v37 }
  0xbc   :  { %v89_v4 = vpop.xlane.xlu0 %88 }
  0xbd   :  { %v94_v5 = vmul.f32 0.03125, %v89_v4 }
  0xbf   :  { %v96_v6 = vsub.f32 %v84_v0, %v94_v5  ;;  %v1623_v0 = vrot.slane %v252_v59, %v259_v37 }
  0xc0   :  { %v136_v7 = vpop.xlane.xlu0 %135 }
  0xc1   :  { %v140_v8 = vmul.f32 0.03125, %v136_v7  ;;  %v98_v9 = vmul.f32 %v96_v6, %v96_v6 }
  0xc3   :  { %v142_v10 = vsub.f32 %v132_v1, %v140_v8  ;;  %v100_v11 = vsel %vm86_vm0, %v98_v9, 0.0  ;;  %v256_v1 = vcombine.high %v252_v59, %v252_v59 }
  0xc4   :  { %101 = vadd.xlane.f32.xlu1 %v100_v11  ;;  %v164_v11 = vld [vmem:[#allocation7] sm:$0xff] }
  0xc5   :  { %v144_v12 = vmul.f32 %v142_v10, %v142_v10  ;;  %v1631_v5 = vrot.slane %v256_v1, %v259_v37  ;;  %v166_v14 = vsel %vm86_vm0, %v164_v11, 0.0 }
  0xc7   :  { %v146_v13 = vsel %vm86_vm0, %v144_v12, 0.0 }
  0xc8   :  { %147 = vadd.xlane.f32.xlu1 %v146_v13 }
 0x14d   :  { %v102_v16 = vpop.xlane.xlu1 %101 }
 0x14e   :  { %v106_v18 = vmul.f32 0.03125, %v102_v16 }
 0x150   :  { %v108_v19 = vadd.f32 1e-05, %v106_v18 }
 0x151   :  { %v148_v22 = vpop.xlane.xlu1 %147 }
 0x152   :  { %1329 = vrsqrt.f32 %v108_v19  ;;  %v152_v25 = vmul.f32 0.03125, %v148_v22 }
 0x154   :  { %v154_v26 = vadd.f32 1e-05, %v152_v25 }
 0x156   :  { %1331 = vrsqrt.f32 %v154_v26  ;;  %v90_v26 = vsel %vm86_vm0, %v85_v23, 0.0 }
 0x15f   :  { %v1330_v32 = vpop.eup %1329 }
 0x160   :  { %v112_v35 = vmul.f32 %v1330_v32, %v96_v6 }
 0x162   :  { %v120_v40 = vmul.f32 %v1593_v33, %v112_v35 }
 0x163   :  { %v1332_v41 = vpop.eup %1331 }
 0x164   :  { %v128_v43 = vadd.f32 %v1598_v38, %v120_v40  ;;  %v158_v44 = vmul.f32 %v1332_v41, %v142_v10 }
 0x166   :  { %v130_v48 = vmul.f32 0.5, %v128_v43  ;;  %v160_v49 = vmul.f32 %v1593_v33, %v158_v44 }
 0x168   :  { %v162_v51 = vadd.f32 %v1598_v38, %v160_v49  ;;  %v297_v52 = vmul.f32 %v1602_v45, %v130_v48  ;;  %v298_v57 = vmul.f32 %v1607_v53, %v130_v48  ;;  %v299_v60 = vmul.f32 %v1609_v55, %v130_v48 }
 0x169   :  { %v300_v63 = vmul.f32 %v1615_v58, %v130_v48  ;;  %v301_v2 = vmul.f32 %v1618_v61, %v130_v48  ;;  %v302_v4 = vmul.f32 %v1623_v0, %v130_v48  ;;  %v303_v6 = vmul.f32 %v1626_v3, %v130_v48 }
 0x16a   :  { %1253 = vmatprep.subr.msk.mxu0 %vm86_vm0, %v162_v51  ;;  %1255 = vmatprep.mubr.msk.f32.mxu0 %vm86_vm0, %v297_v52  ;;  %v304_v7 = vmul.f32 %v1631_v5, %v130_v48 }
 0x16b   :  { %1254 = vmatpush3.xpose.msk.msra.mxu0 %vm86_vm0, %v162_v51 }
 0x16e   :  { %1256 = vmatmul.mubr.msk.f32.vlgmr.msra.gmra.mxu0 %vm86_vm0, %v298_v57 }
 0x16f   :  { %1258 = vmatprep.mubr.msk.f32.mxu0 %vm86_vm0, %v299_v60 }
 0x172   :  { %1259 = vmatmul.mubr.msk.f32.gmra.mxu0 %vm86_vm0, %v300_v63 }
 0x173   :  { %1261 = vmatprep.mubr.msk.f32.mxu0 %vm86_vm0, %v301_v2 }
 0x176   :  { %1262 = vmatmul.mubr.msk.f32.gmra.mxu0 %vm86_vm0, %v302_v4 }
 0x177   :  { %1264 = vmatprep.mubr.msk.f32.mxu0 %vm86_vm0, %v303_v6 }
 0x17a   :  { %1265 = vmatmul.mubr.msk.f32.gmra.mxu0 %vm86_vm0, %v304_v7 }
 0x22e   :  { %v1257_v8 = vpop.f32.mrf.mxu0 }
 0x22f   :  { %v441_v9 = vsel %vm437_vm4, %v1257_v8, -inf }
 0x230   :  { %442 = vmax.xlane.f32.xlu1 %v441_v9  ;;  %v398_v10 = vpop.f32.mrf.mxu0 }
 0x231   :  { %v438_v12 = vsel %vm437_vm4, %v398_v10, -inf }
 0x232   :  { %439 = vmax.xlane.f32.xlu0 %v438_v12  ;;  %v1260_v13 = vpop.f32.mrf.mxu0 }
 0x233   :  { %v447_v19 = vsel %vm437_vm4, %v1260_v13, -inf }
 0x234   :  { %v408_v15 = vpop.f32.mrf.mxu0 }
 0x235   :  { %v444_v16 = vsel %vm437_vm4, %v408_v15, -inf }
 0x236   :  { %167 = vadd.xlane.f32.xlu0 %v166_v14  ;;  %445 = vmax.xlane.f32.xlu1 %v444_v16  ;;  %v1263_v17 = vpop.f32.mrf.mxu0 }
 0x237   :  { %v453_v24 = vsel %vm437_vm4, %v1263_v17, -inf }
 0x238   :  { %v418_v18 = vpop.f32.mrf.mxu0 }
 0x239   :  { %v450_v20 = vsel %vm437_vm4, %v418_v18, -inf }
 0x23a   :  { %448 = vmax.xlane.f32.xlu0 %v447_v19  ;;  %451 = vmax.xlane.f32.xlu1 %v450_v20  ;;  %v1266_v21 = vpop.f32.mrf.mxu0 }
 0x23b   :  { %v459_v28 = vsel %vm437_vm4, %v1266_v21, -inf }
 0x23c   :  { %v428_v22 = vpop.f32.mrf.mxu0 }
 0x23d   :  { %v456_v25 = vsel %vm437_vm4, %v428_v22, -inf }
 0x23e   :  { %454 = vmax.xlane.f32.xlu0 %v453_v24  ;;  %457 = vmax.xlane.f32.xlu1 %v456_v25 }
 0x242   :  { %460 = vmax.xlane.f32.xlu0 %v459_v28  ;;  %91 = vadd.xlane.f32.xlu1 %v90_v26 }
 0x246   :  { %138 = vadd.xlane.f32.xlu0 %v137_v29 }
 0x2b9   :  { %v443_v30 = vpop.xlane.xlu1 %442 }
 0x2ba   :  { %v463_v31 = vsub.f32 %v1257_v8, %v443_v30 }
 0x2bb   :  { %v440_v32 = vpop.xlane.xlu0 %439 }
 0x2bc   :  { %v472_v34 = vmul.f32 1.442695, %v463_v31  ;;  %v462_v35 = vsub.f32 %v398_v10, %v440_v32 }
 0x2be   :  { %1333 = vpow2.f32 %v472_v34  ;;  %v470_v41 = vmul.f32 1.442695, %v462_v35 }
 0x2bf   :  { %v168_v36 = vpop.xlane.xlu0 %167  ;;  %v446_v37 = vpop.xlane.xlu1 %445 }
 0x2c0   :  { %v172_v39 = vmul.f32 0.03125, %v168_v36  ;;  %v464_v40 = vsub.f32 %v408_v15, %v446_v37 }
 0x2c2   :  { %v1649_v42 = vsub.f32 %v164_v11, %v172_v39  ;;  %v474_v43 = vmul.f32 1.442695, %v464_v40 }
 0x2c3   :  { %v449_v44 = vpop.xlane.xlu0 %448  ;;  %v452_v46 = vpop.xlane.xlu1 %451 }
 0x2c4   :  { %1335 = vpow2.f32 %v474_v43  ;;  %v465_v47 = vsub.f32 %v1260_v13, %v449_v44  ;;  %v176_v48 = vmul.f32 %v1649_v42, %v1649_v42  ;;  %v466_v50 = vsub.f32 %v418_v18, %v452_v46 }
 0x2c5   :  { %1337 = vpow2.f32 %v470_v41 }
 0x2c6   :  { %v476_v49 = vmul.f32 1.442695, %v465_v47  ;;  %v178_v51 = vsel %vm86_vm0, %v176_v48, 0.0  ;;  %v478_v57 = vmul.f32 1.442695, %v466_v50 }
 0x2c7   :  { %v455_v52 = vpop.xlane.xlu0 %454  ;;  %179 = vadd.xlane.f32.xlu1 %v178_v51  ;;  %v458_v54 = vpop.xlane.xlu1 %457 }
 0x2c8   :  { %1339 = vpow2.f32 %v476_v49  ;;  %v467_v56 = vsub.f32 %v1263_v17, %v455_v52  ;;  %v468_v60 = vsub.f32 %v428_v22, %v458_v54 }
 0x2ca   :  { %v480_v59 = vmul.f32 1.442695, %v467_v56  ;;  %v482_v7 = vmul.f32 1.442695, %v468_v60 }
 0x2cb   :  { %v1654_v62 = vpop.eup %1333  ;;  %v461_v63 = vpop.xlane.xlu0 %460 }
 0x2cc   :  { %v92_v1 = vpop.xlane.xlu1 %91  ;;  %1341 = vpow2.f32 %v480_v59  ;;  %v469_v2 = vsub.f32 %v1266_v21, %v461_v63  ;;  %v489_v6 = vsel %vm437_vm4, %v1654_v62, 0.0 }
 0x2cd   :  { %v95_v4 = vmul.f32 0.03125, %v92_v1  ;;  %490 = vadd.xlane.f32.xlu1 %v489_v6  ;;  %1343 = vpow2.f32 %v478_v57 }
 0x2ce   :  { %v484_v8 = vmul.f32 1.442695, %v469_v2 }
 0x2cf   :  { %v1658_v9 = vsub.f32 %v85_v23, %v95_v4  ;;  %v139_v10 = vpop.xlane.xlu0 %138 }
 0x2d0   :  { %1345 = vpow2.f32 %v484_v8  ;;  %v141_v11 = vmul.f32 0.03125, %v139_v10 }
 0x2d1   :  { %v99_v12 = vmul.f32 %v1658_v9, %v1658_v9  ;;  %v1662_v13 = vpop.eup %1335  ;;  %1347 = vpow2.f32 %v482_v7 }
 0x2d2   :  { %v1664_v14 = vsub.f32 %v133_v27, %v141_v11  ;;  %v492_v15 = vsel %vm437_vm4, %v1662_v13, 0.0  ;;  %v1338_v17 = vpop.eup %1337 }
 0x2d3   :  { %v103_v16 = vsel %vm86_vm0, %v99_v12, 0.0  ;;  %493 = vadd.xlane.f32.xlu1 %v492_v15  ;;  %v486_v21 = vsel %vm437_vm4, %v1338_v17, 0.0 }
 0x2d4   :  { %104 = vadd.xlane.f32.xlu0 %v103_v16  ;;  %v145_v18 = vmul.f32 %v1664_v14, %v1664_v14 }
 0x2d5   :  { %v1671_v19 = vpop.eup %1339 }
 0x2d6   :  { %v495_v20 = vsel %vm437_vm4, %v1671_v19, 0.0  ;;  %v149_v22 = vsel %vm86_vm0, %v145_v18, 0.0 }
 0x2d7   :  { %496 = vadd.xlane.f32.xlu1 %v495_v20 }
 0x2d8   :  { %487 = vadd.xlane.f32.xlu0 %v486_v21 }
 0x2d9   :  { %v1677_v23 = vpop.eup %1341 }
 0x2da   :  { %v501_v24 = vsel %vm437_vm4, %v1677_v23, 0.0  ;;  %v1681_v25 = vpop.eup %1343 }
 0x2db   :  { %502 = vadd.xlane.f32.xlu1 %v501_v24  ;;  %v498_v28 = vsel %vm437_vm4, %v1681_v25, 0.0 }
 0x2dc   :  { %150 = vadd.xlane.f32.xlu0 %v149_v22 }
 0x2dd   :  { %v1683_v26 = vpop.eup %1345 }
 0x2de   :  { %v507_v27 = vsel %vm437_vm4, %v1683_v26, 0.0  ;;  %v1689_v29 = vpop.eup %1347 }
 0x2df   :  { %508 = vadd.xlane.f32.xlu1 %v507_v27  ;;  %v504_v30 = vsel %vm437_vm4, %v1689_v29, 0.0 }
 0x2e0   :  { %499 = vadd.xlane.f32.xlu0 %v498_v28 }
 0x2e4   :  { %505 = vadd.xlane.f32.xlu0 %v504_v30 }
 0x350   :  { %v180_v31 = vpop.xlane.xlu1 %179 }
 0x351   :  { %v184_v32 = vmul.f32 0.03125, %v180_v31 }
 0x353   :  { %v186_v34 = vadd.f32 1e-05, %v184_v32 }
 0x355   :  { %1349 = vrsqrt.f32 %v186_v34 }
 0x356   :  { %v491_v35 = vpop.xlane.xlu1 %490 }
 0x357   :  { %1351 = vrcp.f32 %v491_v35 }
 0x35c   :  { %v494_v37 = vpop.xlane.xlu1 %493 }
 0x35d   :  { %v105_v36 = vpop.xlane.xlu0 %104  ;;  %1353 = vrcp.f32 %v494_v37 }
 0x35e   :  { %v107_v39 = vmul.f32 0.03125, %v105_v36 }
 0x360   :  { %v109_v40 = vadd.f32 1e-05, %v107_v39  ;;  %v497_v43 = vpop.xlane.xlu1 %496 }
 0x361   :  { %v488_v41 = vpop.xlane.xlu0 %487 }
 0x362   :  { %1355 = vrsqrt.f32 %v109_v40  ;;  %v1350_v44 = vpop.eup %1349 }
 0x363   :  { %1357 = vrcp.f32 %v488_v41  ;;  %v190_v46 = vmul.f32 %v1350_v44, %v1649_v42 }
 0x364   :  { %v503_v48 = vpop.xlane.xlu1 %502  ;;  %1359 = vrcp.f32 %v497_v43  ;;  %v1352_v57 = vpop.eup %1351 }
 0x365   :  { %v151_v47 = vpop.xlane.xlu0 %150  ;;  %v192_v50 = vmul.f32 %v1593_v33, %v190_v46  ;;  %1361 = vrcp.f32 %v503_v48  ;;  %v519_v4 = vmul.f32 %v1352_v57, %v1654_v62 }
 0x366   :  { %v153_v49 = vmul.f32 0.03125, %v151_v47 }
 0x367   :  { %v194_v52 = vadd.f32 %v1598_v38, %v192_v50 }
 0x368   :  { %v155_v51 = vadd.f32 1e-05, %v153_v49  ;;  %v509_v56 = vpop.xlane.xlu1 %508 }
 0x369   :  { %v500_v54 = vpop.xlane.xlu0 %499  ;;  %1267 = vmatprep.subr.mxu1 %v194_v52 }
 0x36a   :  { %1363 = vrsqrt.f32 %v155_v51  ;;  %1268 = vmatpush3.msra.mxu1 %v194_v52  ;;  %v1354_v42 = vpop.eup %1353 }
 0x36b   :  { %1365 = vrcp.f32 %v500_v54  ;;  %v520_v8 = vmul.f32 %v1354_v42, %v1662_v13 }
 0x36c   :  { %1367 = vrcp.f32 %v509_v56 }
 0x36d   :  { %v506_v59 = vpop.xlane.xlu0 %505 }
 0x36e   :  { %1369 = vrcp.f32 %v506_v59 }
 0x36f   :  { %v1356_v60 = vpop.eup %1355 }
 0x370   :  { %v1358_v63 = vpop.eup %1357  ;;  %v113_v1 = vmul.f32 %v1356_v60, %v1658_v9 }
 0x371   :  { %v518_v2 = vmul.f32 %v1358_v63, %v1338_v17  ;;  %v1360_v6 = vpop.eup %1359 }
 0x372   :  { %v121_v7 = vmul.f32 %v1593_v33, %v113_v1  ;;  %v1362_v10 = vpop.eup %1361  ;;  %v521_v11 = vmul.f32 %v1360_v6, %v1671_v19 }
 0x373   :  { %1269 = vmatprep.mubr.msk.f32.mxu1 %vm437_vm4, %v518_v2  ;;  %v523_v13 = vmul.f32 %v1362_v10, %v1677_v23 }
 0x374   :  { %1270 = vmatmul.mubr.msk.f32.vlgmr.msra.gmra.mxu1 %vm437_vm4, %v519_v4  ;;  %v129_v9 = vadd.f32 %v1598_v38, %v121_v7 }
 0x375   :  { %1272 = vmatprep.mubr.msk.f32.mxu1 %vm437_vm4, %v520_v8 }
 0x376   :  { %v131_v21 = vmul.f32 0.5, %v129_v9 }
 0x377   :  { %v1364_v12 = vpop.eup %1363 }
 0x378   :  { %v1366_v15 = vpop.eup %1365  ;;  %1273 = vmatmul.mubr.msk.f32.gmra.mxu1 %vm437_vm4, %v521_v11  ;;  %v159_v62 = vmul.f32 %v1364_v12, %v1664_v14  ;;  %v678_v23 = vmul.f32 %v1602_v45, %v131_v21  ;;  %v679_v24 = vmul.f32 %v1607_v53, %v131_v21  ;;  %v681_v27 = vmul.f32 %v1615_v58, %v131_v21  ;;  %v165_v11 = vld [vmem:[#allocation7 + $0x8] sm:$0xff] }
 0x379   :  { %v522_v16 = vmul.f32 %v1366_v15, %v1681_v25  ;;  %v1368_v17 = vpop.eup %1367  ;;  %v680_v25 = vmul.f32 %v1609_v55, %v131_v21  ;;  %v683_v28 = vmul.f32 %v1623_v0, %v131_v21  ;;  %v685_v30 = vmul.f32 %v1631_v5, %v131_v21 }
 0x37a   :  { %v161_v18 = vmul.f32 %v1593_v33, %v159_v62  ;;  %v525_v14 = vmul.f32 %v1368_v17, %v1683_v26  ;;  %v682_v26 = vmul.f32 %v1618_v61, %v131_v21 }
 0x37b   :  { %v1370_v20 = vpop.eup %1369  ;;  %1275 = vmatprep.mubr.msk.f32.mxu1 %vm437_vm4, %v522_v16  ;;  %v169_v16 = vsel %vm86_vm0, %v165_v11, 0.0 }
 0x37c   :  { %1276 = vmatmul.mubr.msk.f32.gmra.mxu1 %vm437_vm4, %v523_v13  ;;  %v524_v19 = vmul.f32 %v1370_v20, %v1689_v29  ;;  %v163_v22 = vadd.f32 %v1598_v38, %v161_v18  ;;  %v684_v29 = vmul.f32 %v1626_v3, %v131_v21 }
 0x37e   :  { %1278 = vmatprep.mubr.msk.f32.mxu1 %vm437_vm4, %v524_v19  ;;  %1281 = vmatprep.subr.msk.mxu1 %vm86_vm0, %v163_v22 }
 0x37f   :  { %1282 = vmatpush3.xpose.msk.msra.mxu1 %vm86_vm0, %v163_v22 }
 0x380   :  { %1279 = vmatmul.mubr.msk.f32.gmra.mxu1 %vm437_vm4, %v525_v14 }
 0x381   :  { %1283 = vmatprep.mubr.msk.f32.mxu1 %vm86_vm0, %v678_v23 }
 0x384   :  { %1284 = vmatmul.mubr.msk.f32.vlgmr.msra.gmra.mxu1 %vm86_vm0, %v679_v24 }
 0x385   :  { %1286 = vmatprep.mubr.msk.f32.mxu1 %vm86_vm0, %v680_v25 }
 0x388   :  { %1287 = vmatmul.mubr.msk.f32.gmra.mxu1 %vm86_vm0, %v681_v27 }
 0x389   :  { %1289 = vmatprep.mubr.msk.f32.mxu1 %vm86_vm0, %v682_v26 }
 0x38c   :  { %1290 = vmatmul.mubr.msk.f32.gmra.mxu1 %vm86_vm0, %v683_v28 }
 0x38d   :  { %1292 = vmatprep.mubr.msk.f32.mxu1 %vm86_vm0, %v684_v29 }
 0x390   :  { %1293 = vmatmul.mubr.msk.f32.gmra.mxu1 %vm86_vm0, %v685_v30 }
 0x434   :  { %v1271_v31 = vpop.f32.mrf.mxu1 }
 0x435   :  { %v656_v34 = vmul.f32 %v1271_v31, %v1607_v53 }
 0x436   :  { %v616_v32 = vpop.f32.mrf.mxu1 }
 0x437   :  { %v655_v35 = vmul.f32 %v616_v32, %v1602_v45  ;;  %v664_v40 = vsel %vm86_vm0, %v656_v34, 0.0 }
 0x438   :  { %v1274_v36 = vpop.f32.mrf.mxu1 }
 0x439   :  { %v663_v37 = vsel %vm86_vm0, %v655_v35, 0.0  ;;  %v658_v41 = vmul.f32 %v1274_v36, %v1615_v58 }
 0x43a   :  { %v626_v39 = vpop.f32.mrf.mxu1  ;;  %v665_v44 = vadd.f32 %v664_v40, %v663_v37 }
 0x43b   :  { %v657_v43 = vmul.f32 %v626_v39, %v1609_v55  ;;  %v668_v50 = vsel %vm86_vm0, %v658_v41, 0.0 }
 0x43c   :  { %v1277_v46 = vpop.f32.mrf.mxu1 }
 0x43d   :  { %v666_v47 = vsel %vm86_vm0, %v657_v43, 0.0  ;;  %v660_v51 = vmul.f32 %v1277_v46, %v1623_v0 }
 0x43e   :  { %v667_v48 = vadd.f32 %v666_v47, %v665_v44  ;;  %v636_v49 = vpop.f32.mrf.mxu1 }
 0x43f   :  { %v659_v52 = vmul.f32 %v636_v49, %v1618_v61  ;;  %v672_v60 = vsel %vm86_vm0, %v660_v51, 0.0 }
 0x440   :  { %v669_v54 = vadd.f32 %v668_v50, %v667_v48  ;;  %v1280_v56 = vpop.f32.mrf.mxu1 }
 0x441   :  { %v670_v57 = vsel %vm86_vm0, %v659_v52, 0.0  ;;  %v662_v63 = vmul.f32 %v1280_v56, %v1631_v5 }
 0x442   :  { %v671_v59 = vadd.f32 %v670_v57, %v669_v54  ;;  %v646_v42 = vpop.f32.mrf.mxu1 }
 0x443   :  { %v661_v1 = vmul.f32 %v646_v42, %v1626_v3  ;;  %v676_v12 = vsel %vm86_vm0, %v662_v63, 0.0 }
 0x444   :  { %v673_v2 = vadd.f32 %v672_v60, %v671_v59  ;;  %v1285_v4 = vpop.f32.mrf.mxu1 }
 0x445   :  { %v674_v6 = vsel %vm86_vm0, %v661_v1, 0.0  ;;  %v821_v7 = vsel %vm437_vm4, %v1285_v4, -inf }
 0x446   :  { %v675_v8 = vadd.f32 %v674_v6, %v673_v2  ;;  %822 = vmax.xlane.f32.xlu1 %v821_v7  ;;  %v779_v10 = vpop.f32.mrf.mxu1 }
 0x447   :  { %v818_v9 = vsel %vm437_vm4, %v779_v10, -inf }
 0x448   :  { %v677_v15 = vadd.f32 %v676_v12, %v675_v8  ;;  %819 = vmax.xlane.f32.xlu0 %v818_v9  ;;  %v1288_v62 = vpop.f32.mrf.mxu1 }
 0x449   :  { %v827_v21 = vsel %vm437_vm4, %v1288_v62, -inf }
 0x44a   :  { %v789_v17 = vpop.f32.mrf.mxu1  ;;  %1317 = vmatprep.mubr.msk.f32.mxu1 %vm86_vm0, %v677_v15 }
 0x44b   :  { %v824_v13 = vsel %vm437_vm4, %v789_v17, -inf }
 0x44c   :  { %170 = vadd.xlane.f32.xlu0 %v169_v16  ;;  %825 = vmax.xlane.f32.xlu1 %v824_v13  ;;  %v1291_v18 = vpop.f32.mrf.mxu1 }
 0x44d   :  { %v833_v23 = vsel %vm437_vm4, %v1291_v18, -inf }
 0x44e   :  { %v799_v20 = vpop.f32.mrf.mxu1 }
 0x44f   :  { %v830_v19 = vsel %vm437_vm4, %v799_v20, -inf }
 0x450   :  { %828 = vmax.xlane.f32.xlu0 %v827_v21  ;;  %831 = vmax.xlane.f32.xlu1 %v830_v19  ;;  %v1294_v22 = vpop.f32.mrf.mxu1 }
 0x451   :  { %v839_v25 = vsel %vm437_vm4, %v1294_v22, -inf }
 0x452   :  { %v809_v14 = vpop.f32.mrf.mxu1 }
 0x453   :  { %v836_v24 = vsel %vm437_vm4, %v809_v14, -inf }
 0x454   :  { %834 = vmax.xlane.f32.xlu0 %v833_v23  ;;  %837 = vmax.xlane.f32.xlu1 %v836_v24 }
 0x458   :  { %840 = vmax.xlane.f32.xlu0 %v839_v25 }
 0x4cf   :  { %v823_v27 = vpop.xlane.xlu1 %822 }
 0x4d0   :  { %v843_v26 = vsub.f32 %v1285_v4, %v823_v27 }
 0x4d1   :  { %v820_v28 = vpop.xlane.xlu0 %819 }
 0x4d2   :  { %v852_v29 = vmul.f32 1.442695, %v843_v26  ;;  %v842_v30 = vsub.f32 %v779_v10, %v820_v28 }
 0x4d4   :  { %1371 = vpow2.f32 %v852_v29  ;;  %v850_v31 = vmul.f32 1.442695, %v842_v30 }
 0x4d5   :  { %v171_v32 = vpop.xlane.xlu0 %170  ;;  %v826_v34 = vpop.xlane.xlu1 %825 }
 0x4d6   :  { %1373 = vpow2.f32 %v850_v31  ;;  %v173_v35 = vmul.f32 0.03125, %v171_v32  ;;  %v844_v36 = vsub.f32 %v789_v17, %v826_v34 }
 0x4d8   :  { %v1761_v37 = vsub.f32 %v165_v11, %v173_v35  ;;  %v854_v39 = vmul.f32 1.442695, %v844_v36 }
 0x4d9   :  { %v829_v40 = vpop.xlane.xlu0 %828  ;;  %v832_v41 = vpop.xlane.xlu1 %831 }
 0x4da   :  { %1375 = vpow2.f32 %v854_v39  ;;  %v845_v43 = vsub.f32 %v1288_v62, %v829_v40  ;;  %v846_v44 = vsub.f32 %v799_v20, %v832_v41  ;;  %v177_v46 = vmul.f32 %v1761_v37, %v1761_v37 }
 0x4dc   :  { %v856_v47 = vmul.f32 1.442695, %v845_v43  ;;  %v858_v48 = vmul.f32 1.442695, %v846_v44  ;;  %v181_v49 = vsel %vm86_vm0, %v177_v46, 0.0 }
 0x4dd   :  { %v835_v50 = vpop.xlane.xlu0 %834  ;;  %182 = vadd.xlane.f32.xlu1 %v181_v49  ;;  %v838_v51 = vpop.xlane.xlu1 %837 }
 0x4de   :  { %1377 = vpow2.f32 %v856_v47  ;;  %v847_v52 = vsub.f32 %v1291_v18, %v835_v50  ;;  %v848_v54 = vsub.f32 %v809_v14, %v838_v51  ;;  %v1061_v50 = vld [vmem:[#allocation8 + $0x18] sm:$0xff]  ;;  %v1060_v51 = vld [vmem:[#allocation8 + $0x10] sm:$0xff] }
 0x4df   :  { %1379 = vpow2.f32 %v858_v48  ;;  %1309 = vmatprep.subr.mxu1 %v1061_v50 }
 0x4e0   :  { %v860_v56 = vmul.f32 1.442695, %v847_v52  ;;  %v862_v57 = vmul.f32 1.442695, %v848_v54  ;;  %1310 = vmatpush3.msra.mxu1 %v1061_v50  ;;  %v1059_v52 = vld [vmem:[#allocation8 + $0x8] sm:$0xff]  ;;  %v1058_v54 = vld [vmem:[#allocation8] sm:$0xff] }
 0x4e1   :  { %v1372_v59 = vpop.eup %1371  ;;  %v841_v42 = vpop.xlane.xlu0 %840  ;;  %1311 = vmatprep.subr.mxu1 %v1060_v51 }
 0x4e2   :  { %1381 = vpow2.f32 %v860_v56  ;;  %v849_v60 = vsub.f32 %v1294_v22, %v841_v42  ;;  %v869_v63 = vsel %vm437_vm4, %v1372_v59, 0.0  ;;  %1312 = vmatpush3.msra.mxu1 %v1060_v51 }
 0x4e3   :  { %v1374_v1 = vpop.eup %1373  ;;  %1383 = vpow2.f32 %v862_v57  ;;  %870 = vadd.xlane.f32.xlu1 %v869_v63  ;;  %1313 = vmatprep.subr.mxu1 %v1059_v52 }
 0x4e4   :  { %v864_v2 = vmul.f32 1.442695, %v849_v60  ;;  %v866_v4 = vsel %vm437_vm4, %v1374_v1, 0.0  ;;  %1314 = vmatpush3.msra.mxu1 %v1059_v52 }
 0x4e5   :  { %867 = vadd.xlane.f32.xlu0 %v866_v4  ;;  %1315 = vmatprep.subr.mxu1 %v1058_v54 }
 0x4e6   :  { %1385 = vpow2.f32 %v864_v2  ;;  %1316 = vmatpush3.msra.mxu1 %v1058_v54 }
 0x4e7   :  { %v1376_v6 = vpop.eup %1375 }
 0x4e8   :  { %v872_v7 = vsel %vm437_vm4, %v1376_v6, 0.0 }
 0x4e9   :  { %873 = vadd.xlane.f32.xlu0 %v872_v7 }
 0x4eb   :  { %v1378_v8 = vpop.eup %1377 }
 0x4ec   :  { %v1380_v10 = vpop.eup %1379  ;;  %v875_v11 = vsel %vm437_vm4, %v1378_v8, 0.0 }
 0x4ed   :  { %v878_v12 = vsel %vm437_vm4, %v1380_v10, 0.0  ;;  %876 = vadd.xlane.f32.xlu1 %v875_v11 }
 0x4ee   :  { %879 = vadd.xlane.f32.xlu0 %v878_v12 }
 0x4ef   :  { %v1382_v9 = vpop.eup %1381 }
 0x4f0   :  { %v1384_v15 = vpop.eup %1383  ;;  %v881_v62 = vsel %vm437_vm4, %v1382_v9, 0.0 }
 0x4f1   :  { %882 = vadd.xlane.f32.xlu1 %v881_v62  ;;  %v884_v16 = vsel %vm437_vm4, %v1384_v15, 0.0 }
 0x4f2   :  { %885 = vadd.xlane.f32.xlu0 %v884_v16 }
 0x4f3   :  { %v1386_v17 = vpop.eup %1385 }
 0x4f4   :  { %v887_v13 = vsel %vm437_vm4, %v1386_v17, 0.0 }
 0x4f5   :  { %888 = vadd.xlane.f32.xlu1 %v887_v13 }
 0x566   :  { %v183_v18 = vpop.xlane.xlu1 %182 }
 0x567   :  { %v185_v20 = vmul.f32 0.03125, %v183_v18 }
 0x569   :  { %v187_v21 = vadd.f32 1e-05, %v185_v20 }
 0x56b   :  { %1387 = vrsqrt.f32 %v187_v21 }
 0x56c   :  { %v871_v19 = vpop.xlane.xlu1 %870 }
 0x56d   :  { %1389 = vrcp.f32 %v871_v19 }
 0x56e   :  { %v868_v22 = vpop.xlane.xlu0 %867 }
 0x56f   :  { %1391 = vrcp.f32 %v868_v22 }
 0x572   :  { %v874_v14 = vpop.xlane.xlu0 %873 }
 0x573   :  { %1393 = vrcp.f32 %v874_v14 }
 0x576   :  { %v877_v23 = vpop.xlane.xlu1 %876 }
 0x577   :  { %v880_v24 = vpop.xlane.xlu0 %879  ;;  %1395 = vrcp.f32 %v877_v23 }
 0x578   :  { %v1388_v25 = vpop.eup %1387  ;;  %1397 = vrcp.f32 %v880_v24 }
 0x579   :  { %v191_v27 = vmul.f32 %v1388_v25, %v1761_v37 }
 0x57a   :  { %v883_v26 = vpop.xlane.xlu1 %882  ;;  %v1390_v28 = vpop.eup %1389 }
 0x57b   :  { %v886_v29 = vpop.xlane.xlu0 %885  ;;  %1399 = vrcp.f32 %v883_v26  ;;  %v193_v30 = vmul.f32 %v1593_v33, %v191_v27  ;;  %v899_v36 = vmul.f32 %v1390_v28, %v1372_v59 }
 0x57c   :  { %v1392_v31 = vpop.eup %1391  ;;  %1401 = vrcp.f32 %v886_v29 }
 0x57d   :  { %v195_v32 = vadd.f32 %v1598_v38, %v193_v30  ;;  %v898_v34 = vmul.f32 %v1392_v31, %v1374_v1 }
 0x57e   :  { %v889_v35 = vpop.xlane.xlu1 %888 }
 0x57f   :  { %1403 = vrcp.f32 %v889_v35  ;;  %1295 = vmatprep.subr.mxu0 %v195_v32  ;;  %1297 = vmatprep.mubr.msk.f32.mxu0 %vm437_vm4, %v898_v34 }
 0x580   :  { %v1394_v39 = vpop.eup %1393  ;;  %1296 = vmatpush3.msra.mxu0 %v195_v32 }
 0x581   :  { %1298 = vmatmul.mubr.msk.f32.vlgmr.msra.gmra.mxu0 %vm437_vm4, %v899_v36  ;;  %v900_v37 = vmul.f32 %v1394_v39, %v1376_v6 }
 0x583   :  { %1300 = vmatprep.mubr.msk.f32.mxu0 %vm437_vm4, %v900_v37 }
 0x584   :  { %v1396_v40 = vpop.eup %1395 }
 0x585   :  { %v1398_v33 = vpop.eup %1397  ;;  %v901_v41 = vmul.f32 %v1396_v40, %v1378_v8 }
 0x586   :  { %v902_v43 = vmul.f32 %v1398_v33, %v1380_v10 }
 0x587   :  { %1301 = vmatmul.mubr.msk.f32.gmra.mxu0 %vm437_vm4, %v901_v41 }
 0x588   :  { %v1400_v38 = vpop.eup %1399  ;;  %1303 = vmatprep.mubr.msk.f32.mxu0 %vm437_vm4, %v902_v43 }
 0x589   :  { %v1402_v44 = vpop.eup %1401  ;;  %v903_v46 = vmul.f32 %v1400_v38, %v1382_v9 }
 0x58a   :  { %v904_v47 = vmul.f32 %v1402_v44, %v1384_v15 }
 0x58b   :  { %1304 = vmatmul.mubr.msk.f32.gmra.mxu0 %vm437_vm4, %v903_v46 }
 0x58c   :  { %v1404_v48 = vpop.eup %1403  ;;  %1306 = vmatprep.mubr.msk.f32.mxu0 %vm437_vm4, %v904_v47 }
 0x58d   :  { %v905_v49 = vmul.f32 %v1404_v48, %v1386_v17 }
 0x58f   :  { %1307 = vmatmul.mubr.msk.f32.gmra.mxu0 %vm437_vm4, %v905_v49 }
 0x641   :  { %v1299_v56 = vpop.f32.mrf.mxu0 }
 0x642   :  { %v1036_v42 = vmul.f32 %v1299_v56, %v1607_v53 }
 0x643   :  { %v996_v57 = vpop.f32.mrf.mxu0 }
 0x644   :  { %v1035_v59 = vmul.f32 %v996_v57, %v1602_v45  ;;  %v1044_v2 = vsel %vm86_vm0, %v1036_v42, 0.0 }
 0x646   :  { %v1043_v63 = vsel %vm86_vm0, %v1035_v59, 0.0 }
 0x647   :  { %v1302_v60 = vpop.f32.mrf.mxu0  ;;  %v1045_v7 = vadd.f32 %v1044_v2, %v1043_v63 }
 0x648   :  { %v1038_v4 = vmul.f32 %v1302_v60, %v1615_v58 }
 0x649   :  { %v1006_v1 = vpop.f32.mrf.mxu0 }
 0x64a   :  { %v1037_v6 = vmul.f32 %v1006_v1, %v1609_v55  ;;  %v1048_v45 = vsel %vm86_vm0, %v1038_v4, 0.0 }
 0x64b   :  { %v1305_v8 = vpop.f32.mrf.mxu0 }
 0x64c   :  { %v1046_v10 = vsel %vm86_vm0, %v1037_v6, 0.0  ;;  %v1040_v53 = vmul.f32 %v1305_v8, %v1623_v0 }
 0x64d   :  { %v1047_v11 = vadd.f32 %v1046_v10, %v1045_v7  ;;  %v1016_v12 = vpop.f32.mrf.mxu0 }
 0x64e   :  { %v1039_v9 = vmul.f32 %v1016_v12, %v1618_v61  ;;  %v1052_v55 = vsel %vm86_vm0, %v1040_v53, 0.0  ;;  %v1208_v61 = vld [vmem:[%s1819_s6] ss:$0 sm:$0xff] }
 0x64f   :  { %v1049_v15 = vadd.f32 %v1048_v45, %v1047_v11  ;;  %v1308_v62 = vpop.f32.mrf.mxu0 }
 0x650   :  { %v1050_v16 = vsel %vm86_vm0, %v1039_v9, 0.0  ;;  %v1042_v13 = vmul.f32 %v1308_v62, %v1631_v5 }
 0x651   :  { %v1051_v17 = vadd.f32 %v1050_v16, %v1049_v15  ;;  %v1026_v58 = vpop.f32.mrf.mxu0 }
 0x652   :  { %v1041_v18 = vmul.f32 %v1026_v58, %v1626_v3  ;;  %v1056_v0 = vsel %vm86_vm0, %v1042_v13, 0.0 }
 0x653   :  { %v1053_v20 = vadd.f32 %v1052_v55, %v1051_v17 }
 0x654   :  { %v1054_v21 = vsel %vm86_vm0, %v1041_v18, 0.0 }
 0x655   :  { %v1055_v19 = vadd.f32 %v1054_v21, %v1053_v20 }
 0x657   :  { %v1057_v22 = vadd.f32 %v1056_v0, %v1055_v19 }
 0x659   :  { %1318 = vmatmul.mubr.msk.f32.vlgmr.msra.gmra.mxu1 %vm86_vm0, %v1057_v22 }
 0x719   :  { %v1319_v14 = vpop.f32.mrf.mxu1 }
 0x71a   :  { %v1147_v23 = vadd.f32 %v1319_v14, %v1208_v61 }
 0x71b   :  { %v1141_v5 = vpop.f32.mrf.mxu1 }
 0x71c   :  { %1151 = vst.msk [vmem:[#allocation10 + $0x8] sm:$0xff] %vm86_vm0, %v1147_v23  ;;  %v1142_v3 = vadd.f32 %v1208_v61, %v1141_v5 }
 0x71e   :  { %1150 = vst.msk [vmem:[#allocation10] sm:$0xff] %vm86_vm0, %v1142_v3 }
 0x71f   :  { %1496 = shalt.err (!%p1493_p10)
}
 0x720   :  { %1163 = dma.vmem_to_hbm [thread:$0]  %s1158_s24, 256, %s1820_s7, [#allocation4], %s1515_s29, %s1515_s29, %s1516_s30  }
 0x721   :  { %1511 = dma.done.wait [#allocation4], 256  }
 0x722   :  { %1512 = vsyncadd [#allocation4], 4294967040 }
 0x723   :  { %1167 = vsyncpa [#allocation3], 1 }
 0x724   :  { %1168 = vsyncpa [#allocation6], 1 }
 0x725   :  { %1169 = vsyncpa [#allocation9], 1 }
 0x726   :  { %1170 = vsyncpa [#allocation4], 1 }

</bundles_post_ra>
